<compile_context>
chip_gen: v6e
topology: v6e:2x2x1
jax: 0.10.0
libtpu: 0.0.40
codegen_flags: <defaults>
</compile_context>

<pallas_src>
import jax
import jax.numpy as jnp
import numpy as np
from jax import lax
from jax.experimental import pallas as pl
from jax.experimental.pallas import tpu as pltpu


def _round_up(x, m):
    return ((x + m - 1) // m) * m


def _phase_taps(K, stride, padding):
    # Output position t = i*stride + k - padding.  Write t = j*stride + s:
    #   s_k = (k - padding) mod stride,  q_k = (k - padding - s_k) / stride,  i = j - q_k.
    taps = []
    for k in range(K):
        s_k = (k - padding) % stride
        q_k = (k - padding - s_k) // stride
        taps.append((k, s_k, q_k))
    return taps


def _make_kernel(C_in, C_out_pad, K, stride, L_in, L_lanes, taps):
    rows3 = 3 * C_out_pad                       # rows per tap: [r | g | quad], each C_out_pad
    taps_by_phase = [[(k, q) for (k, s, q) in taps if s == ph] for ph in range(stride)]

    def kernel(x_ref, w_ref, b_ref, mask_ref, o_ref, xbuf_ref):
        # ---- build [x ; x*x], lane-dense and zero past L_in, entirely on-chip ----
        xbuf_ref[...] = jnp.zeros_like(xbuf_ref)            # (2*C_in, L_lanes), cheap
        x = x_ref[0]                                        # (C_in, L_in), unpadded block
        xbuf_ref[0:C_in, 0:L_in] = x
        xbuf_ref[C_in:2 * C_in, 0:L_in] = x * x             # quadratic input built on-chip
        xcat = xbuf_ref[...]                                 # (2*C_in, L_lanes)

        # ---- ONE fused MXU matmul: all K taps x {r, g, quad} branches ----
        # w_ref rows ordered (k, branch, co_pad); contraction = [x rows | x^2 rows].
        z = jnp.dot(w_ref[...], xcat,
                    preferred_element_type=jnp.float32)      # (K*3*C_out_pad, L_lanes)

        # Bias, broadcast once (hoisted out of the phase loop).
        bias_b = jnp.broadcast_to(b_ref[...], (rows3, L_lanes))

        # ---- phase-outer / tap-inner accumulation; rolls on XLU, masks on VPU ----
        outs = []
        for s in range(stride):
            acc = bias_b                                     # biases folded into init
            for (k, q) in taps_by_phase[s]:
                zk = z[k * rows3:(k + 1) * rows3, :]         # sublane-aligned slice
                if q != 0:
                    # rolled[:, j] = zk[:, (j - q) mod L_lanes]; mask keeps 0 <= j-q < L_in
                    zk = pltpu.roll(zk, shift=q % L_lanes, axis=1)
                    zk = zk * mask_ref[k:k + 1, :]
                # q == 0 taps need no mask: xcat is zero past L_in, so z is zero there.
                acc = acc + zk
            r = acc[0:C_out_pad, :]
            g = acc[C_out_pad:2 * C_out_pad, :]
            quad = acc[2 * C_out_pad:3 * C_out_pad, :]
            outs.append(r * g + quad)

        # Single lane-dense, sublane-aligned store of the whole phase-layout block.
        o_ref[0] = jnp.concatenate(outs, axis=0).astype(o_ref.dtype)

    return kernel


def conv_trans_quadratic(x, wr, wg, wb, br, bg, bb, *, stride, padding):
    """x: (N, C_in, L_in) f32; w*: (C_in, C_out, K); b*: (C_out,). Returns (N, C_out, L_out)."""
    N, C_in, L_in = x.shape
    _, C_out, K = wr.shape
    L_out = (L_in - 1) * stride - 2 * padding + K
    L_phase = -(-L_out // stride)                      # ceil(L_out / stride)
    L_lanes = _round_up(max(L_in, L_phase), 128)       # lane-dense working width
    C_out_pad = _round_up(C_out, 8)                    # sublane-aligned channel rows
    K_pad = _round_up(K, 8)
    taps = _phase_taps(K, stride, padding)

    x = x.astype(jnp.float32)

    # --- one-time tiny weight/bias repack: rows (k, branch, co_pad), block-diag over
    #     the [x ; x^2] contraction so a single dot serves all three branches ---
    wr_t = jnp.transpose(wr, (2, 1, 0)).astype(jnp.float32)   # (K, C_out, C_in)
    wg_t = jnp.transpose(wg, (2, 1, 0)).astype(jnp.float32)
    wb_t = jnp.transpose(wb, (2, 1, 0)).astype(jnp.float32)
    w_all = jnp.zeros((K, 3, C_out_pad, 2 * C_in), jnp.float32)
    w_all = w_all.at[:, 0, :C_out, :C_in].set(wr_t)           # r  branch <- x rows
    w_all = w_all.at[:, 1, :C_out, :C_in].set(wg_t)           # g  branch <- x rows
    w_all = w_all.at[:, 2, :C_out, C_in:].set(wb_t)           # quad branch <- x^2 rows
    w_all = w_all.reshape(K * 3 * C_out_pad, 2 * C_in)

    b_all = jnp.zeros((3, C_out_pad), jnp.float32)
    b_all = b_all.at[0, :C_out].set(br).at[1, :C_out].set(bg).at[2, :C_out].set(bb)
    b_all = b_all.reshape(3 * C_out_pad, 1)

    # --- static per-tap lane-validity masks: mask[k, j] = [0 <= j - q_k < L_in].
    #     Built host-side once; DMA'd once (constant index_map), stays VMEM-resident. ---
    lane = np.arange(L_lanes)
    mask_np = np.zeros((K_pad, L_lanes), np.float32)
    for k, _, q in taps:
        mask_np[k] = ((lane - q >= 0) & (lane - q < L_in)).astype(np.float32)
    masks = jnp.asarray(mask_np)

    kernel = _make_kernel(C_in, C_out_pad, K, stride, L_in, L_lanes, taps)

    out_phase = pl.pallas_call(
        kernel,
        out_shape=jax.ShapeDtypeStruct((N, stride * C_out_pad, L_lanes), jnp.float32),
        grid_spec=pltpu.PrefetchScalarGridSpec(
            num_scalar_prefetch=0,
            grid=(N,),                                 # one batch element per step
            in_specs=[
                pl.BlockSpec((1, C_in, L_in), lambda n: (n, 0, 0)),        # unpadded x
                pl.BlockSpec((K * 3 * C_out_pad, 2 * C_in), lambda n: (0, 0)),
                pl.BlockSpec((3 * C_out_pad, 1), lambda n: (0, 0)),
                pl.BlockSpec((K_pad, L_lanes), lambda n: (0, 0)),
            ],
            out_specs=pl.BlockSpec((1, stride * C_out_pad, L_lanes), lambda n: (n, 0, 0)),
            scratch_shapes=[pltpu.VMEM((2 * C_in, L_lanes), jnp.float32)],  # [x ; x^2]
        ),
        compiler_params=pltpu.CompilerParams(
            dimension_semantics=("parallel",),
        ),
    )(x, w_all, b_all, masks)

    # Phase de-interleave: y[n, co, j*stride + s] = out_phase[n, s*C_out_pad + co, j].
    y = out_phase.reshape(N, stride, C_out_pad, L_lanes)[:, :, :C_out, :]
    y = jnp.transpose(y, (0, 2, 3, 1)).reshape(N, C_out, L_lanes * stride)
    return y[:, :, :L_out]


# ---------------- pure-JAX reference (for correctness check) ----------------
def _conv_transpose1d_ref(x, w, b, stride, padding):
    # PyTorch conv_transpose1d: weight (C_in, C_out, K), input dilation = stride,
    # pad K-1-p, cross-correlate with flipped/transposed kernel.
    _, _, K = w.shape
    rhs = jnp.flip(jnp.transpose(w, (1, 0, 2)), axis=-1)   # (C_out, C_in, K)
    y = lax.conv_general_dilated(
        x, rhs, window_strides=(1,),
        padding=[(K - 1 - padding, K - 1 - padding)],
        lhs_dilation=(stride,), rhs_dilation=(1,),
        dimension_numbers=("NCH", "OIH", "NCH"))
    return y + b[None, :, None]


def _forward_ref(x, wr, wg, wb, br, bg, bb, stride, padding):
    return (_conv_transpose1d_ref(x, wr, br, stride, padding)
            * _conv_transpose1d_ref(x, wg, bg, stride, padding)
            + _conv_transpose1d_ref(x * x, wb, bb, stride, padding))


if __name__ == "__main__":
    # Module config (small shapes): in_channels=4, out_channels=8, kernel_size=3,
    # stride=2, padding=1; input x: (N=2, C_in=4, L_in=16) -> L_out=31.
    in_channels, out_channels, kernel_size, stride, padding = 4, 8, 3, 2, 1
    N, L_in = 2, 16

    key = jax.random.PRNGKey(0)
    kx, kr, kg, kb, kbr, kbg, kbb = jax.random.split(key, 7)
    fan_in = in_channels * kernel_size
    bound_w = float(np.sqrt(6.0 / fan_in) / np.sqrt(1.0 + 5.0))  # kaiming_uniform(a=sqrt(5))
    bound_b = float(1.0 / np.sqrt(fan_in))

    # Deterministic synthetic init (module default zeros weight_g/weight_b; use small
    # random values here so the quadratic path is actually exercised by the kernel).
    weight_r = jax.random.uniform(kr, (in_channels, out_channels, kernel_size),
                                  jnp.float32, -bound_w, bound_w)
    weight_g = jax.random.uniform(kg, (in_channels, out_channels, kernel_size),
                                  jnp.float32, -bound_w, bound_w)
    weight_b = jax.random.uniform(kb, (in_channels, out_channels, kernel_size),
                                  jnp.float32, -bound_w, bound_w)
    bias_r = jax.random.uniform(kbr, (out_channels,), jnp.float32, -bound_b, bound_b)
    bias_g = jax.random.uniform(kbg, (out_channels,), jnp.float32, -bound_b, bound_b) + 1.0
    bias_b = jax.random.uniform(kbb, (out_channels,), jnp.float32, -bound_b, bound_b)

    x = jax.random.normal(kx, (N, in_channels, L_in), jnp.float32)

    out = conv_trans_quadratic(x, weight_r, weight_g, weight_b,
                               bias_r, bias_g, bias_b,
                               stride=stride, padding=padding)
    out = jax.block_until_ready(out)

    ref = _forward_ref(x, weight_r, weight_g, weight_b,
                       bias_r, bias_g, bias_b, stride, padding)
    np.testing.assert_allclose(np.asarray(out), np.asarray(ref), rtol=1e-4, atol=1e-4)

    print("KERNEL_OK")
</pallas_src>

<mosaic_0001>
module attributes {stable_mosaic.version = 11 : i64} {
  func.func @kernel(%arg0: i32, %arg1: memref<1x4x16xf32, #tpu.memory_space<vmem>>, %arg2: memref<72x8xf32, #tpu.memory_space<vmem>>, %arg3: memref<24x1xf32, #tpu.memory_space<vmem>>, %arg4: memref<8x128xf32, #tpu.memory_space<vmem>>, %arg5: memref<1x16x128xf32, #tpu.memory_space<vmem>>, %arg6: memref<8x128xf32, #tpu.memory_space<vmem>>) attributes {dimension_semantics = [#tpu.dimension_semantics<parallel>], iteration_bounds = array<i64: 2>, scalar_prefetch = 0 : i64, scratch_operands = 1 : i64, tpu.core_type = #tpu.core_type<tc>, window_params = [{transform_indices = @transform_0, window_bounds = array<i64: 1, 4, 16>}, {pipeline_mode = #tpu.pipeline_mode<synchronous>, transform_indices = @transform_1, window_bounds = array<i64: 72, 8>}, {pipeline_mode = #tpu.pipeline_mode<synchronous>, transform_indices = @transform_2, window_bounds = array<i64: 24, 1>}, {pipeline_mode = #tpu.pipeline_mode<synchronous>, transform_indices = @transform_3, window_bounds = array<i64: 8, 128>}, {transform_indices = @transform_4, window_bounds = array<i64: 1, 16, 128>}]} {
    %cst = arith.constant 0.000000e+00 : f32
    %0 = vector.broadcast %cst : f32 to vector<8x128xf32>
    %c0 = arith.constant 0 : index
    %c0_0 = arith.constant 0 : index
    %1 = vector.load %arg6[%c0, %c0_0] : memref<8x128xf32, #tpu.memory_space<vmem>>, vector<8x128xf32>
    tpu.vector_store %arg6[%c0, %c0_0], %0 {strides = array<i32>} : memref<8x128xf32, #tpu.memory_space<vmem>>, vector<8x128xf32>,
    %c0_1 = arith.constant 0 : index
    %c0_2 = arith.constant 0 : index
    %c0_3 = arith.constant 0 : index
    %2 = vector.load %arg1[%c0_1, %c0_2, %c0_3] : memref<1x4x16xf32, #tpu.memory_space<vmem>>, vector<1x4x16xf32>
    %3 = vector.shape_cast %2 : vector<1x4x16xf32> to vector<4x16xf32>
    %c0_4 = arith.constant 0 : index
    %c0_5 = arith.constant 0 : index
    %4 = vector.load %arg6[%c0_4, %c0_5] : memref<8x128xf32, #tpu.memory_space<vmem>>, vector<4x16xf32>
    tpu.vector_store %arg6[%c0_4, %c0_5], %3 {strides = array<i32>} : memref<8x128xf32, #tpu.memory_space<vmem>>, vector<4x16xf32>,
    %5 = arith.mulf %3, %3 : vector<4x16xf32>
    %c4 = arith.constant 4 : index
    %c0_6 = arith.constant 0 : index
    %6 = vector.load %arg6[%c4, %c0_6] : memref<8x128xf32, #tpu.memory_space<vmem>>, vector<4x16xf32>
    tpu.vector_store %arg6[%c4, %c0_6], %5 {strides = array<i32>} : memref<8x128xf32, #tpu.memory_space<vmem>>, vector<4x16xf32>,
    %c0_7 = arith.constant 0 : index
    %c0_8 = arith.constant 0 : index
    %7 = vector.load %arg6[%c0_7, %c0_8] : memref<8x128xf32, #tpu.memory_space<vmem>>, vector<8x128xf32>
    %c0_9 = arith.constant 0 : index
    %c0_10 = arith.constant 0 : index
    %8 = vector.load %arg2[%c0_9, %c0_10] : memref<72x8xf32, #tpu.memory_space<vmem>>, vector<72x8xf32>
    %cst_11 = arith.constant dense<0.000000e+00> : vector<72x128xf32>
    %9 = tpu.matmul %8, %7, %cst_11 {dimension_numbers = #tpu.dot_dimension_numbers<[1], [0], [0], [1], [0, 0, 1, 1], [], []>} : vector<72x8xf32>, vector<8x128xf32>, vector<72x128xf32> -> vector<72x128xf32>
    %c0_12 = arith.constant 0 : index
    %c0_13 = arith.constant 0 : index
    %10 = vector.load %arg3[%c0_12, %c0_13] : memref<24x1xf32, #tpu.memory_space<vmem>>, vector<24x1xf32>
    %11 = vector.shape_cast %10 : vector<24x1xf32> to vector<24x1xf32>
    %12 = vector.broadcast %11 : vector<24x1xf32> to vector<24x128xf32>
    %13 = vector.extract_strided_slice %9 {offsets = [24, 0], sizes = [24, 128], strides = [1, 1]} : vector<72x128xf32> to vector<24x128xf32>
    %14 = arith.addf %12, %13 : vector<24x128xf32>
    %15 = vector.extract_strided_slice %14 {offsets = [0, 0], sizes = [8, 128], strides = [1, 1]} : vector<24x128xf32> to vector<8x128xf32>
    %16 = vector.extract_strided_slice %14 {offsets = [8, 0], sizes = [8, 128], strides = [1, 1]} : vector<24x128xf32> to vector<8x128xf32>
    %17 = vector.extract_strided_slice %14 {offsets = [16, 0], sizes = [8, 128], strides = [1, 1]} : vector<24x128xf32> to vector<8x128xf32>
    %18 = arith.mulf %15, %16 : vector<8x128xf32>
    %19 = arith.addf %18, %17 : vector<8x128xf32>
    %20 = vector.extract_strided_slice %9 {offsets = [0, 0], sizes = [24, 128], strides = [1, 1]} : vector<72x128xf32> to vector<24x128xf32>
    %c127_i32 = arith.constant 127 : i32
    %21 = tpu.dynamic_rotate %20 by %c127_i32 dim 1 : vector<24x128xf32>, i32 -> vector<24x128xf32>
    %c0_14 = arith.constant 0 : index
    %c0_15 = arith.constant 0 : index
    %22 = vector.load %arg4[%c0_14, %c0_15] : memref<8x128xf32, #tpu.memory_space<vmem>>, vector<1x128xf32>
    %23 = vector.broadcast %22 : vector<1x128xf32> to vector<24x128xf32>
    %24 = arith.mulf %21, %23 : vector<24x128xf32>
    %25 = arith.addf %12, %24 : vector<24x128xf32>
    %26 = vector.extract_strided_slice %9 {offsets = [48, 0], sizes = [24, 128], strides = [1, 1]} : vector<72x128xf32> to vector<24x128xf32>
    %27 = arith.addf %25, %26 : vector<24x128xf32>
    %28 = vector.extract_strided_slice %27 {offsets = [0, 0], sizes = [8, 128], strides = [1, 1]} : vector<24x128xf32> to vector<8x128xf32>
    %29 = vector.extract_strided_slice %27 {offsets = [8, 0], sizes = [8, 128], strides = [1, 1]} : vector<24x128xf32> to vector<8x128xf32>
    %30 = vector.extract_strided_slice %27 {offsets = [16, 0], sizes = [8, 128], strides = [1, 1]} : vector<24x128xf32> to vector<8x128xf32>
    %31 = arith.mulf %28, %29 : vector<8x128xf32>
    %32 = arith.addf %31, %30 : vector<8x128xf32>
    %33 = tpu.concatenate %19, %32 in 0 : vector<8x128xf32>, vector<8x128xf32> -> vector<16x128xf32>
    %c0_16 = arith.constant 0 : index
    %c0_17 = arith.constant 0 : index
    %c0_18 = arith.constant 0 : index
    %34 = vector.load %arg5[%c0_16, %c0_17, %c0_18] : memref<1x16x128xf32, #tpu.memory_space<vmem>>, vector<1x16x128xf32>
    %35 = vector.shape_cast %34 : vector<1x16x128xf32> to vector<16x128xf32>
    %36 = vector.shape_cast %33 : vector<16x128xf32> to vector<1x16x128xf32>
    tpu.vector_store %arg5[%c0_16, %c0_17, %c0_18], %36 {strides = array<i32>} : memref<1x16x128xf32, #tpu.memory_space<vmem>>, vector<1x16x128xf32>,
    return
  }
  func.func @transform_0(%arg0: i32) -> (i32, i32, i32) {
    %c0_i32 = arith.constant 0 : i32
    %c0_i32_0 = arith.constant 0 : i32
    %c0_i32_1 = arith.constant 0 : i32
    return %arg0, %c0_i32, %c0_i32_0 : i32, i32, i32
  }
  func.func @transform_1(%arg0: i32) -> (i32, i32) {
    %c0_i32 = arith.constant 0 : i32
    %c0_i32_0 = arith.constant 0 : i32
    %c0_i32_1 = arith.constant 0 : i32
    return %c0_i32, %c0_i32_0 : i32, i32
  }
  func.func @transform_2(%arg0: i32) -> (i32, i32) {
    %c0_i32 = arith.constant 0 : i32
    %c0_i32_0 = arith.constant 0 : i32
    %c0_i32_1 = arith.constant 0 : i32
    return %c0_i32, %c0_i32_0 : i32, i32
  }
  func.func @transform_3(%arg0: i32) -> (i32, i32) {
    %c0_i32 = arith.constant 0 : i32
    %c0_i32_0 = arith.constant 0 : i32
    %c0_i32_1 = arith.constant 0 : i32
    return %c0_i32, %c0_i32_0 : i32, i32
  }
  func.func @transform_4(%arg0: i32) -> (i32, i32, i32) {
    %c0_i32 = arith.constant 0 : i32
    %c0_i32_0 = arith.constant 0 : i32
    %c0_i32_1 = arith.constant 0 : i32
    return %arg0, %c0_i32, %c0_i32_0 : i32, i32, i32
  }
}

</mosaic_0001>

<bundles_post_ra>
// kernel: tpu_custom_call.1
= control target key start
LH: loop header
LB: loop body
LE: loop exit
PB: predicated region body
PF: predicated region fallthrough
CT: control target
= control target key end

     0   :  { %9 = vsyncpa [#allocation4], 0  ;;  %s837_s0 = inlined_call_operand.vmem [shape: f32[2,4,16], index: 0, kind: input, shape index: {}]   ;;  %s838_s1 = inlined_call_operand.vmem [shape: f32[72,8], index: 1, kind: input, shape index: {}]   ;;  %s839_s2 = inlined_call_operand.vmem [shape: f32[24,1], index: 2, kind: input, shape index: {}]   ;;  %s840_s3 = inlined_call_operand.vmem [shape: f32[8,128], index: 3, kind: input, shape index: {}]   ;;  %s841_s4 = inlined_call_operand.hbm [shape: f32[2,16,128], index: 4, kind: output, shape index: {}]  }
   0x1   :  { %11 = vsyncpa [#allocation4 + $0x1], 0  ;;  %s674_s15 = smov 0   ;;  %s676_s16 = smov 0  }
   0x2   :  { %s678_s17 = smov 0   ;;  %s680_s18 = smov 0  }
   0x3 LB: > { %s695_s19 = sadd.s32 4294967295, %s640_s18   ;;  %s470_s20 = sadd.s32 4294967294, %s640_s18   ;;  %s640_s18 = sphi %s680_s18, %s847_s18   ;;  %s636_s17 = sphi %s678_s17, %s846_s17   ;;  %s632_s16 = sphi %s676_s16, %s845_s16   ;;  %s628_s15 = sphi %s674_s15, %s844_s15  }
   0x4   : > { %s699_s21 = sadd.s32 1, %s640_s18   ;;  %s113_s22 = sadd.s32 1, %s636_s17 }
   0x5   : > { %s110_s23 = ssub.s32 %s640_s18, %s699_s21  ;;  %p123_p0 = scmp.ne.s32.totalorder %s636_s17, %s632_s16 }
   0x6   : > { %p111_p1 = scmp.eq.s32.totalorder %s110_s23, 0  ;;  %p124_p2 = scmp.eq.s32.totalorder %s695_s19, 1 }
   0x7   : > { %p129_p3 = scmp.ne.s32.totalorder %s632_s16, %s628_s15  ;;  %p130_p4 = scmp.eq.s32.totalorder %s470_s20, 1 }
   0x8   : > { %s710_s24 = scalar_select %p111_p1, %s636_s17, %s113_s22  }
   0x9   : > { %p712_p5 = por %p124_p2, %p123_p0  ;;  %p716_p6 = por %p130_p4, %p129_p3 }
   0xa   : > { %p473_p7 = scmp.ge.s32.totalorder %s640_s18, 1  ;;  %p164_p8 = scmp.lt.s32.totalorder %s640_s18, 3 }
   0xc   : > { %p165_p9 = pnand %p473_p7, %p164_p8 }
   0xd   : > { %p189_p10 = scmp.lt.s32.totalorder (!%p165_p9), %s695_s19, 1  ;;  %s645_s13 = smov (!%p165_p9), 127  }
   0xe   : > { %168 = sbr.rel (%p165_p9) target bundleno = 373 (0x175), region = 36  ;;  %s186_s14 = sand.u32 (!%p165_p9), 1, %s632_s16  }
   0xf   : > { %s474_s20 = sshll.u32 (!%p165_p9), %s186_s14, 4  ;;  %s491_s29 = sshll.u32 (!%p165_p9), %s695_s19, 8 }
  0x10   : > { %s188_s22 = scalar_lea.vmem (!%p165_p9), [#allocation3], %s474_s20  ;;  %s793_s6 = scalar_lea.hbm (!%p165_p9), %s841_s4, %s491_s29 }
  0x11   : > { %s408_s28 = sshll.u32 (!%p165_p9), %s188_s22, 4  ;;  %s797_s7 = scalar_lea.sflag (!%p165_p9), [#allocation4], %s186_s14  ;;  %s788_s28 = int_to_ptr.vmem [resolvable:$true] %s408_s28 }
  0x12   : > { %s580_s8 = scalar_lea.vmem (!%p165_p9), %s788_s28, 256 }
  0x13   : > { %v642_v0 = vmov 0.0   ;;  %vm643_vm0 = vmmov 0   ;;  %s190_s27 = scalar_select %p189_p10, %s695_s19, 1  ;;  %v644_v1 = vmov 0   ;;  %v347_v2 = vld [vmem:[%s839_s2] sm:$0xff]  ;;  %vm195_vm1 = vcmask 125952  }
  0x14   : > { %502 = vmatprep.subr.mxu0 %v642_v0  ;;  %193 = vst [vmem:[#allocation2] sm:$0xff] %v642_v0  ;;  %504 = vmatprep.mubr.msk.f32.mxu0 %vm643_vm0, %v642_v0  ;;  %v349_v3 = vld [vmem:[%s839_s2 + $0x10] sm:$0xff]  ;;  %v348_v4 = vld [vmem:[%s839_s2 + $0x8] sm:$0xff]  ;;  %v200_v7 = vld [vmem:[%s838_s1] sm:$0xff]  ;;  %vm209_vm2 = vcmask 64512   ;;  %p581_p11 = scmp.ne.s32.totalorder %s788_s28, %s580_s8  ;;  %s646_s19 = smov [#allocation3]  }
  0x15   : > { %531 = vmatprep.subr.mxu1 %v642_v0  ;;  %519 = vmatprep.mubr.msk.f32.mxu1 %vm643_vm0, %v642_v0  ;;  %s475_s30 = sshll.u32 %s190_s27, 2  ;;  %v205_v8 = vld [vmem:[%s838_s1 + $0x28] sm:$0xff]  ;;  %v206_v11 = vld [vmem:[%s838_s1 + $0x30] sm:$0xff]  ;;  %v207_v13 = vld [vmem:[%s838_s1 + $0x38] sm:$0xff] }
  0x16   : > { %578 = vset.pattern.permute.xlu0 %v644_v1  ;;  %579 = vset.pattern.permute.xlu1 %v644_v1  ;;  %s192_s9 = scalar_lea.vmem %s837_s0, %s475_s30  ;;  %v201_v10 = vld [vmem:[%s838_s1 + $0x8] sm:$0xff]  ;;  %v202_v12 = vld [vmem:[%s838_s1 + $0x10] sm:$0xff]  ;;  %v203_v14 = vld [vmem:[%s838_s1 + $0x18] sm:$0xff]  ;;  %p582_p12 = pnand %p581_p11, %p712_p5 }
  0x17   : > { %352 = vperm.xlu0 %578, %v347_v2   ;;  %362 = vperm.xlu1 %579, %v349_v3   ;;  %v194_v5 = vld [vmem:[%s192_s9] sm:$0xf]  ;;  %s584_s9 = sshll.u32 %s646_s19, 4  ;;  %s585_s9 = int_to_ptr.vmem [resolvable:$false] %s584_s9 }
  0x18   : > { %196 = vst.msk [vmem:[#allocation2] sm:$0xf] %vm195_vm1, %v194_v5  ;;  %v197_v6 = vmul.f32 %v194_v5, %v194_v5  ;;  %v208_v15 = vld [vmem:[%s838_s1 + $0x40] sm:$0xff]  ;;  %p583_p13 = pneg %p582_p12  ;;  %s586_s10 = scalar_lea.vmem %s585_s9, 512 }
  0x19   : > { %v204_v16 = vld [vmem:[%s838_s1 + $0x20] sm:$0xff]  ;;  %p587_p0 = scmp.lt.s32.totalorder %s788_s28, %s585_s9  ;;  %p588_p1 = scmp.lt.s32.totalorder %s586_s10, %s580_s8 }
  0x1a   : > { %198 = vst.msk [vmem:[#allocation2 + $0x4] sm:$0xf] %vm195_vm1, %v197_v6  ;;  %v485_v43 = vld [vmem:[%s840_s3] ss:$0 sm:$0xff] }
  0x1b   : > { %357 = vperm.xlu0 %578, %v348_v4   ;;  %p589_p2 = por %p588_p1, %p587_p0 }
  0x1d   : > { %p590_p3 = pnand %p589_p2, %p583_p13 }
  0x21   : > { %v199_v9 = vld [vmem:[#allocation2] sm:$0xff] }
  0x22   : > { %503 = vmatpush3.msra.mxu0 %v199_v9  ;;  %532 = vmatpush3.msra.mxu1 %v199_v9 }
  0x23   : > { %505 = vmatmul.mubr.msk.f32.vlgmr.msra.gmra.mxu0 %vm209_vm2, %v200_v7  ;;  %520 = vmatmul.mubr.msk.f32.vlgmr.msra.gmra.mxu1 %vm209_vm2, %v205_v8 }
  0x24   : > { %507 = vmatprep.mubr.msk.f32.mxu0 %vm643_vm0, %v642_v0  ;;  %522 = vmatprep.mubr.msk.f32.mxu1 %vm643_vm0, %v642_v0 }
  0x27   : > { %508 = vmatmul.mubr.msk.f32.gmra.mxu0 %vm209_vm2, %v201_v10  ;;  %523 = vmatmul.mubr.msk.f32.gmra.mxu1 %vm209_vm2, %v206_v11 }
  0x28   : > { %510 = vmatprep.mubr.msk.f32.mxu0 %vm643_vm0, %v642_v0  ;;  %525 = vmatprep.mubr.msk.f32.mxu1 %vm643_vm0, %v642_v0 }
  0x2b   : > { %511 = vmatmul.mubr.msk.f32.gmra.mxu0 %vm209_vm2, %v202_v12  ;;  %526 = vmatmul.mubr.msk.f32.gmra.mxu1 %vm209_vm2, %v207_v13 }
  0x2c   : > { %513 = vmatprep.mubr.msk.f32.mxu0 %vm643_vm0, %v642_v0  ;;  %528 = vmatprep.mubr.msk.f32.mxu1 %vm643_vm0, %v642_v0 }
  0x2f   : > { %514 = vmatmul.mubr.msk.f32.gmra.mxu0 %vm209_vm2, %v203_v14  ;;  %529 = vmatmul.mubr.msk.f32.gmra.mxu1 %vm209_vm2, %v208_v15 }
  0x30   : > { %516 = vmatprep.mubr.msk.f32.mxu0 %vm643_vm0, %v642_v0 }
  0x33   : > { %517 = vmatmul.mubr.msk.f32.gmra.mxu0 %vm209_vm2, %v204_v16 }
  0x92   : > { %v353_v25 = vpop.permute.xlu0 %352  ;;  %v363_v36 = vpop.permute.xlu1 %362 }
  0x96   : > { %v358_v32 = vpop.permute.xlu0 %357 }
  0xe3   : > { %v303_v17 = vpop.f32.mrf.mxu0  ;;  %v328_v18 = vpop.f32.mrf.mxu1 }
  0xe4   : > { %370 = vrot.lane.b32.xlu1 %v303_v17, %s645_s13  ;;  %v367_v39 = vadd.f32 %v363_v36, %v328_v18 }
  0xe5   : > { %v506_v19 = vpop.f32.mrf.mxu0  ;;  %v521_v20 = vpop.f32.mrf.mxu1 }
  0xe7   : > { %v308_v21 = vpop.f32.mrf.mxu0  ;;  %v333_v22 = vpop.f32.mrf.mxu1 }
  0xe8   : > { %372 = vrot.lane.b32.xlu0 %v308_v21, %s645_s13 }
  0xe9   : > { %v509_v23 = vpop.f32.mrf.mxu0  ;;  %v524_v24 = vpop.f32.mrf.mxu1 }
  0xeb   : > { %v313_v26 = vpop.f32.mrf.mxu0  ;;  %v338_v27 = vpop.f32.mrf.mxu1 }
  0xec   : > { %374 = vrot.lane.b32.xlu1 %v313_v26, %s645_s13 }
  0xed   : > { %v512_v28 = vpop.f32.mrf.mxu0  ;;  %v527_v29 = vpop.f32.mrf.mxu1 }
  0xef   : > { %v318_v30 = vpop.f32.mrf.mxu0  ;;  %v343_v31 = vpop.f32.mrf.mxu1 }
  0xf0   : > { %v365_v35 = vadd.f32 %v353_v25, %v318_v30 }
  0xf1   : > { %v515_v33 = vpop.f32.mrf.mxu0  ;;  %v530_v34 = vpop.f32.mrf.mxu1 }
  0xf3   : > { %v323_v37 = vpop.f32.mrf.mxu0 }
  0xf4   : > { %v366_v38 = vadd.f32 %v358_v32, %v323_v37 }
  0xf5   : > { %v518_v40 = vpop.f32.mrf.mxu0 }
  0xf6   : > { %v368_v41 = vmul.f32 %v366_v38, %v365_v35 }
  0xf8   : > { %v369_v42 = vadd.f32 %v368_v41, %v367_v39 }
  0xfa   : > { %392 = vst [vmem:[%s188_s22] sm:$0xff] %v369_v42 }
 0x156   : > { %v371_v44 = vpop.permute.xlu1 %370 }
 0x157   : > { %v381_v45 = vmul.f32 %v485_v43, %v371_v44 }
 0x159   : > { %v384_v48 = vadd.f32 %v381_v45, %v353_v25 }
 0x15a   : > { %v373_v46 = vpop.permute.xlu0 %372 }
 0x15b   : > { %v382_v47 = vmul.f32 %v485_v43, %v373_v46  ;;  %v387_v53 = vadd.f32 %v384_v48, %v333_v22 }
 0x15d   : > { %v385_v49 = vadd.f32 %v382_v47, %v358_v32 }
 0x15e   : > { %v375_v50 = vpop.permute.xlu1 %374 }
 0x15f   : > { %v388_v51 = vadd.f32 %v385_v49, %v338_v27  ;;  %v383_v52 = vmul.f32 %v485_v43, %v375_v50 }
 0x161   : > { %v386_v54 = vadd.f32 %v383_v52, %v363_v36  ;;  %v390_v55 = vmul.f32 %v388_v51, %v387_v53 }
 0x163   : > { %v389_v56 = vadd.f32 %v386_v54, %v343_v31 }
 0x165   : > { %v391_v57 = vadd.f32 %v390_v55, %v389_v56 }
 0x167   : > { %393 = vst [vmem:[%s188_s22 + $0x8] sm:$0xff] %v391_v57 }
 0x168   : > { %593 = shalt.err (!%p590_p3)
}
 0x169   : > { %s594_s11 = scalar_lea.hbm %s793_s6, 256  ;;  %s598_s14 = scalar_lea.hbm %s841_s4, 512 }
 0x16a   : > { %p595_p4 = scmp.ne.s32.totalorder %s793_s6, %s594_s11  ;;  %p599_p9 = scmp.lt.s32.totalorder %s793_s6, %s841_s4 }
 0x16b   : > { %p600_p10 = scmp.lt.s32.totalorder %s598_s14, %s594_s11 }
 0x16c   : > { %p596_p7 = pnand %p595_p4, %p712_p5 }
 0x16d   : > { %p601_p11 = por %p600_p10, %p599_p9 }
 0x16e   : > { %p597_p8 = pneg %p596_p7 }
 0x170   : > { %p602_p12 = pnand %p601_p11, %p597_p8 }
 0x172   : > { %605 = shalt.err (!%p602_p12)
}
 0x173   : > { %s647_s23 = smov 128   ;;  %s648_s27 = smov 8  }
 0x174   : > { %533 = dma.vmem_to_hbm [thread:$0]  (%p712_p5), %s788_s28, 256, %s793_s6, %s797_s7, %s647_s23, %s647_s23, %s648_s27  }
 0x175 PF: > { %p539_p13 = scmp.ge.s32.totalorder %s640_s18, 2  ;;  %s423_s29 = sand.u32 1, %s628_s15  }
 0x176   : > { %s424_s30 = scalar_lea.sflag [#allocation4], %s423_s29 }
 0x177   : > { %p536_p0 = pnand %p539_p13, %p716_p6 }
 0x179   : > { %p537_p1 = pneg %p536_p0 }
 0x17b   : > { %623 = dma.done.wait (%p537_p1), %s424_s30, 256  }
 0x17c   : > { %625 = vsyncadd (%p537_p1), %s424_s30, 4294967040  ;;  %p14_p2 = scmp.ge.s32.totalorder %s699_s21, 4   ;;  %s844_s15 = smov %s632_s16 }
 0x17d   : > { %s845_s16 = smov %s636_s17  ;;  %s846_s17 = smov %s710_s24 }
 0x17e   : > { %s847_s18 = smov %s699_s21  ;;  %16 = sbr.rel (!%p14_p2) target bundleno = 3 (0x3), region = 71 }
 0x183   :  { %429 = vsyncpa [#allocation4], 1 }
 0x184   :  { %431 = vsyncpa [#allocation4 + $0x1], 1 }

</bundles_post_ra>
